<compile_context>
chip_gen: v5e
topology: v5e:2x2
jax: 0.10.0
libtpu: 0.0.40
codegen_flags: <defaults>
</compile_context>

<pallas_src>
import jax
import jax.numpy as jnp
from jax.experimental import pallas as pl
from jax.experimental.pallas import tpu as pltpu


def _make_sepconv_kernel(k, W, matmul_dtype=None):
    """Build the fused kernel for a given (static) kernel size and image width."""
    p = k // 2

    def kernel(x_ref, dw_ref, pw_ref, mask_ref, o_ref):
        # x_ref:    (1, Cin, HW)     flat NCHW image, H*W on the lane axis
        # dw_ref:   (k*k, Cin, 1)    depthwise tap weights (per-channel)
        # pw_ref:   (Cout, Cin)      pointwise weights
        # mask_ref: (k*k, 1, HW)     'same'-padding validity masks (0/1)
        # o_ref:    (1, Cout, HW)    lane-dense output (== flat NCHW)
        HW = x_ref.shape[2]

        # Stage 1: depthwise kxk on the VPU/XLU.  One load of the image; each
        # tap is an XLU lane roll + two VPU multiplies + one add.
        x = x_ref[0].astype(jnp.float32)                      # (Cin, HW)
        acc_dw = jnp.zeros(x.shape, jnp.float32)
        t = 0
        for dy in range(k):
            for dx in range(k):
                oy, ox = dy - p, dx - p
                off = oy * W + ox                              # flat tap offset
                if off == 0:
                    shifted = x
                else:
                    # out[i] = x[i + off]  (wrap-around killed by the mask)
                    shifted = pltpu.roll(x, shift=(-off) % HW, axis=1)
                if oy == 0 and ox == 0:
                    tap = shifted                              # center: all valid
                else:
                    tap = shifted * mask_ref[t]                # (Cin,HW)*(1,HW)
                acc_dw = acc_dw + tap * dw_ref[t]              # * (Cin,1)
                t += 1

        # Stage 2: pointwise 1x1 as a single MXU matmul, f32 accumulate.
        lhs = pw_ref[...]
        rhs = acc_dw
        if matmul_dtype is not None:
            lhs = lhs.astype(matmul_dtype)
            rhs = rhs.astype(matmul_dtype)
        else:
            lhs = lhs.astype(jnp.float32)
        out = jnp.dot(lhs, rhs, preferred_element_type=jnp.float32)  # (Cout,HW)

        o_ref[0] = out.astype(o_ref.dtype)

    return kernel


def separable_conv2d(x_nchw, dw_torch, pw_torch, *, matmul_dtype=None):
    """SeparableConv2d.forward (bias=False, padding='same', stride=1).

    x_nchw:   (N, Cin, H, W)     PyTorch-layout input
    dw_torch: (Cin, 1, k, k)     depthwise Conv2d weight (groups=Cin)
    pw_torch: (Cout, Cin, 1, 1)  pointwise Conv2d weight
    returns   (N, Cout, H, W)    PyTorch-layout output
    """
    N, Cin, H, W = x_nchw.shape
    Cout = pw_torch.shape[0]
    k = dw_torch.shape[-1]
    assert dw_torch.shape == (Cin, 1, k, k)
    assert pw_torch.shape == (Cout, Cin, 1, 1)
    assert k % 2 == 1, "even kernel_size ('same' asymmetric pad) not implemented"
    p = k // 2
    HW = H * W

    # NCHW -> (N, Cin, H*W): pure minor-dim merge, no transpose, no copy.
    x_flat = x_nchw.reshape(N, Cin, HW)

    # Depthwise taps as (k*k, Cin, 1): dw_taps[dy*k+dx, ci, 0] = dw[ci,0,dy,dx].
    dw_taps = jnp.transpose(dw_torch[:, 0].reshape(Cin, k * k), (1, 0))[..., None]
    dw_taps = dw_taps.astype(jnp.float32)
    # Pointwise as (Cout, Cin).
    pw = pw_torch[:, :, 0, 0]

    # Per-tap 'same'-padding validity masks over the flattened H*W lane axis,
    # built once here (tiny; resident in VMEM across the whole grid).
    hh = jnp.arange(H, dtype=jnp.int32)[:, None]     # (H, 1)
    ww = jnp.arange(W, dtype=jnp.int32)[None, :]     # (1, W)
    mask_list = []
    for dy in range(k):
        for dx in range(k):
            oy, ox = dy - p, dx - p
            valid = ((hh + oy >= 0) & (hh + oy < H) &
                     (ww + ox >= 0) & (ww + ox < W))           # (H, W)
            mask_list.append(valid.reshape(1, HW))
    masks = jnp.stack(mask_list).astype(jnp.float32)           # (k*k, 1, HW)

    kernel = _make_sepconv_kernel(k, W, matmul_dtype=matmul_dtype)

    out_flat = pl.pallas_call(
        kernel,
        out_shape=jax.ShapeDtypeStruct((N, Cout, HW), x_nchw.dtype),
        grid_spec=pltpu.PrefetchScalarGridSpec(
            num_scalar_prefetch=0,
            grid=(N,),
            in_specs=[
                pl.BlockSpec((1, Cin, HW), lambda n: (n, 0, 0)),
                pl.BlockSpec((k * k, Cin, 1), lambda n: (0, 0, 0)),
                pl.BlockSpec((Cout, Cin), lambda n: (0, 0)),
                pl.BlockSpec((k * k, 1, HW), lambda n: (0, 0, 0)),
            ],
            out_specs=pl.BlockSpec((1, Cout, HW), lambda n: (n, 0, 0)),
        ),
        compiler_params=pltpu.CompilerParams(
            dimension_semantics=("parallel",),
            # Blocks here are a few KiB, so the default scoped-VMEM limit is
            # plenty; re-derive per generation once H-tiling is added for
            # production shapes (see TODO at top).
        ),
    )(x_flat, dw_taps, pw, masks)

    # (N, Cout, H*W) -> (N, Cout, H, W): pure minor-dim split; the result is
    # already in PyTorch NCHW layout (no transpose anywhere).
    return out_flat.reshape(N, Cout, H, W)


# ------------------------- pure-JAX reference -------------------------------
def separable_conv2d_ref(x_nchw, dw_torch, pw_torch):
    Cin = x_nchw.shape[1]
    y = jax.lax.conv_general_dilated(
        x_nchw, dw_torch, (1, 1), "SAME",
        dimension_numbers=("NCHW", "OIHW", "NCHW"),
        feature_group_count=Cin)
    y = jax.lax.conv_general_dilated(
        y, pw_torch, (1, 1), "SAME",
        dimension_numbers=("NCHW", "OIHW", "NCHW"))
    return y


# ------------------------------ demo -----------------------------------------
if __name__ == "__main__":
    key = jax.random.PRNGKey(0)
    kx, kd, kp = jax.random.split(key, 3)

    N, Cin, H, W = 2, 4, 16, 16
    Cout, K = 8, 3

    x = jax.random.normal(kx, (N, Cin, H, W), jnp.float32)              # NCHW
    dw = 0.2 * jax.random.normal(kd, (Cin, 1, K, K), jnp.float32)       # depthwise
    pw = 0.2 * jax.random.normal(kp, (Cout, Cin, 1, 1), jnp.float32)    # pointwise

    out = jax.block_until_ready(jax.jit(separable_conv2d)(x, dw, pw))
    ref = jax.block_until_ready(separable_conv2d_ref(x, dw, pw))

    assert out.shape == (N, Cout, H, W)
    assert jnp.allclose(out, ref, atol=1e-4, rtol=1e-4), "mismatch vs reference"

    print("KERNEL_OK")
</pallas_src>

<mosaic_0001>
module attributes {stable_mosaic.version = 11 : i64} {
  func.func @kernel(%arg0: i32, %arg1: memref<1x4x256xf32, #tpu.memory_space<vmem>>, %arg2: memref<9x4x1xf32, #tpu.memory_space<vmem>>, %arg3: memref<8x4xf32, #tpu.memory_space<vmem>>, %arg4: memref<9x1x256xf32, #tpu.memory_space<vmem>>, %arg5: memref<1x8x256xf32, #tpu.memory_space<vmem>>) attributes {dimension_semantics = [#tpu.dimension_semantics<parallel>], iteration_bounds = array<i64: 2>, scalar_prefetch = 0 : i64, scratch_operands = 0 : i64, tpu.core_type = #tpu.core_type<tc>, window_params = [{transform_indices = @transform_0, window_bounds = array<i64: 1, 4, 256>}, {pipeline_mode = #tpu.pipeline_mode<synchronous>, transform_indices = @transform_1, window_bounds = array<i64: 9, 4, 1>}, {pipeline_mode = #tpu.pipeline_mode<synchronous>, transform_indices = @transform_2, window_bounds = array<i64: 8, 4>}, {pipeline_mode = #tpu.pipeline_mode<synchronous>, transform_indices = @transform_3, window_bounds = array<i64: 9, 1, 256>}, {transform_indices = @transform_4, window_bounds = array<i64: 1, 8, 256>}]} {
    %c0 = arith.constant 0 : index
    %c0_0 = arith.constant 0 : index
    %c0_1 = arith.constant 0 : index
    %0 = vector.load %arg1[%c0, %c0_0, %c0_1] : memref<1x4x256xf32, #tpu.memory_space<vmem>>, vector<1x4x256xf32>
    %1 = vector.shape_cast %0 : vector<1x4x256xf32> to vector<4x256xf32>
    %cst = arith.constant 0.000000e+00 : f32
    %2 = vector.broadcast %cst : f32 to vector<4x256xf32>
    %c17_i32 = arith.constant 17 : i32
    %3 = tpu.dynamic_rotate %1 by %c17_i32 dim 1 : vector<4x256xf32>, i32 -> vector<4x256xf32>
    %c0_2 = arith.constant 0 : index
    %c0_3 = arith.constant 0 : index
    %c0_4 = arith.constant 0 : index
    %4 = vector.load %arg4[%c0_2, %c0_3, %c0_4] : memref<9x1x256xf32, #tpu.memory_space<vmem>>, vector<1x1x256xf32>
    %5 = vector.shape_cast %4 : vector<1x1x256xf32> to vector<1x256xf32>
    %6 = vector.broadcast %5 : vector<1x256xf32> to vector<4x256xf32>
    %7 = arith.mulf %3, %6 : vector<4x256xf32>
    %c0_5 = arith.constant 0 : index
    %c0_6 = arith.constant 0 : index
    %c0_7 = arith.constant 0 : index
    %8 = vector.load %arg2[%c0_5, %c0_6, %c0_7] : memref<9x4x1xf32, #tpu.memory_space<vmem>>, vector<1x4x1xf32>
    %9 = vector.shape_cast %8 : vector<1x4x1xf32> to vector<4x1xf32>
    %10 = vector.broadcast %9 : vector<4x1xf32> to vector<4x256xf32>
    %11 = arith.mulf %7, %10 : vector<4x256xf32>
    %12 = arith.addf %2, %11 : vector<4x256xf32>
    %c16_i32 = arith.constant 16 : i32
    %13 = tpu.dynamic_rotate %1 by %c16_i32 dim 1 : vector<4x256xf32>, i32 -> vector<4x256xf32>
    %c1 = arith.constant 1 : index
    %c0_8 = arith.constant 0 : index
    %c0_9 = arith.constant 0 : index
    %14 = vector.load %arg4[%c1, %c0_8, %c0_9] : memref<9x1x256xf32, #tpu.memory_space<vmem>>, vector<1x1x256xf32>
    %15 = vector.shape_cast %14 : vector<1x1x256xf32> to vector<1x256xf32>
    %16 = vector.broadcast %15 : vector<1x256xf32> to vector<4x256xf32>
    %17 = arith.mulf %13, %16 : vector<4x256xf32>
    %c1_10 = arith.constant 1 : index
    %c0_11 = arith.constant 0 : index
    %c0_12 = arith.constant 0 : index
    %18 = vector.load %arg2[%c1_10, %c0_11, %c0_12] : memref<9x4x1xf32, #tpu.memory_space<vmem>>, vector<1x4x1xf32>
    %19 = vector.shape_cast %18 : vector<1x4x1xf32> to vector<4x1xf32>
    %20 = vector.broadcast %19 : vector<4x1xf32> to vector<4x256xf32>
    %21 = arith.mulf %17, %20 : vector<4x256xf32>
    %22 = arith.addf %12, %21 : vector<4x256xf32>
    %c15_i32 = arith.constant 15 : i32
    %23 = tpu.dynamic_rotate %1 by %c15_i32 dim 1 : vector<4x256xf32>, i32 -> vector<4x256xf32>
    %c2 = arith.constant 2 : index
    %c0_13 = arith.constant 0 : index
    %c0_14 = arith.constant 0 : index
    %24 = vector.load %arg4[%c2, %c0_13, %c0_14] : memref<9x1x256xf32, #tpu.memory_space<vmem>>, vector<1x1x256xf32>
    %25 = vector.shape_cast %24 : vector<1x1x256xf32> to vector<1x256xf32>
    %26 = vector.broadcast %25 : vector<1x256xf32> to vector<4x256xf32>
    %27 = arith.mulf %23, %26 : vector<4x256xf32>
    %c2_15 = arith.constant 2 : index
    %c0_16 = arith.constant 0 : index
    %c0_17 = arith.constant 0 : index
    %28 = vector.load %arg2[%c2_15, %c0_16, %c0_17] : memref<9x4x1xf32, #tpu.memory_space<vmem>>, vector<1x4x1xf32>
    %29 = vector.shape_cast %28 : vector<1x4x1xf32> to vector<4x1xf32>
    %30 = vector.broadcast %29 : vector<4x1xf32> to vector<4x256xf32>
    %31 = arith.mulf %27, %30 : vector<4x256xf32>
    %32 = arith.addf %22, %31 : vector<4x256xf32>
    %c1_i32 = arith.constant 1 : i32
    %33 = tpu.dynamic_rotate %1 by %c1_i32 dim 1 : vector<4x256xf32>, i32 -> vector<4x256xf32>
    %c3 = arith.constant 3 : index
    %c0_18 = arith.constant 0 : index
    %c0_19 = arith.constant 0 : index
    %34 = vector.load %arg4[%c3, %c0_18, %c0_19] : memref<9x1x256xf32, #tpu.memory_space<vmem>>, vector<1x1x256xf32>
    %35 = vector.shape_cast %34 : vector<1x1x256xf32> to vector<1x256xf32>
    %36 = vector.broadcast %35 : vector<1x256xf32> to vector<4x256xf32>
    %37 = arith.mulf %33, %36 : vector<4x256xf32>
    %c3_20 = arith.constant 3 : index
    %c0_21 = arith.constant 0 : index
    %c0_22 = arith.constant 0 : index
    %38 = vector.load %arg2[%c3_20, %c0_21, %c0_22] : memref<9x4x1xf32, #tpu.memory_space<vmem>>, vector<1x4x1xf32>
    %39 = vector.shape_cast %38 : vector<1x4x1xf32> to vector<4x1xf32>
    %40 = vector.broadcast %39 : vector<4x1xf32> to vector<4x256xf32>
    %41 = arith.mulf %37, %40 : vector<4x256xf32>
    %42 = arith.addf %32, %41 : vector<4x256xf32>
    %c4 = arith.constant 4 : index
    %c0_23 = arith.constant 0 : index
    %c0_24 = arith.constant 0 : index
    %43 = vector.load %arg2[%c4, %c0_23, %c0_24] : memref<9x4x1xf32, #tpu.memory_space<vmem>>, vector<1x4x1xf32>
    %44 = vector.shape_cast %43 : vector<1x4x1xf32> to vector<4x1xf32>
    %45 = vector.broadcast %44 : vector<4x1xf32> to vector<4x256xf32>
    %46 = arith.mulf %1, %45 : vector<4x256xf32>
    %47 = arith.addf %42, %46 : vector<4x256xf32>
    %c255_i32 = arith.constant 255 : i32
    %48 = tpu.dynamic_rotate %1 by %c255_i32 dim 1 : vector<4x256xf32>, i32 -> vector<4x256xf32>
    %c5 = arith.constant 5 : index
    %c0_25 = arith.constant 0 : index
    %c0_26 = arith.constant 0 : index
    %49 = vector.load %arg4[%c5, %c0_25, %c0_26] : memref<9x1x256xf32, #tpu.memory_space<vmem>>, vector<1x1x256xf32>
    %50 = vector.shape_cast %49 : vector<1x1x256xf32> to vector<1x256xf32>
    %51 = vector.broadcast %50 : vector<1x256xf32> to vector<4x256xf32>
    %52 = arith.mulf %48, %51 : vector<4x256xf32>
    %c5_27 = arith.constant 5 : index
    %c0_28 = arith.constant 0 : index
    %c0_29 = arith.constant 0 : index
    %53 = vector.load %arg2[%c5_27, %c0_28, %c0_29] : memref<9x4x1xf32, #tpu.memory_space<vmem>>, vector<1x4x1xf32>
    %54 = vector.shape_cast %53 : vector<1x4x1xf32> to vector<4x1xf32>
    %55 = vector.broadcast %54 : vector<4x1xf32> to vector<4x256xf32>
    %56 = arith.mulf %52, %55 : vector<4x256xf32>
    %57 = arith.addf %47, %56 : vector<4x256xf32>
    %c241_i32 = arith.constant 241 : i32
    %58 = tpu.dynamic_rotate %1 by %c241_i32 dim 1 : vector<4x256xf32>, i32 -> vector<4x256xf32>
    %c6 = arith.constant 6 : index
    %c0_30 = arith.constant 0 : index
    %c0_31 = arith.constant 0 : index
    %59 = vector.load %arg4[%c6, %c0_30, %c0_31] : memref<9x1x256xf32, #tpu.memory_space<vmem>>, vector<1x1x256xf32>
    %60 = vector.shape_cast %59 : vector<1x1x256xf32> to vector<1x256xf32>
    %61 = vector.broadcast %60 : vector<1x256xf32> to vector<4x256xf32>
    %62 = arith.mulf %58, %61 : vector<4x256xf32>
    %c6_32 = arith.constant 6 : index
    %c0_33 = arith.constant 0 : index
    %c0_34 = arith.constant 0 : index
    %63 = vector.load %arg2[%c6_32, %c0_33, %c0_34] : memref<9x4x1xf32, #tpu.memory_space<vmem>>, vector<1x4x1xf32>
    %64 = vector.shape_cast %63 : vector<1x4x1xf32> to vector<4x1xf32>
    %65 = vector.broadcast %64 : vector<4x1xf32> to vector<4x256xf32>
    %66 = arith.mulf %62, %65 : vector<4x256xf32>
    %67 = arith.addf %57, %66 : vector<4x256xf32>
    %c240_i32 = arith.constant 240 : i32
    %68 = tpu.dynamic_rotate %1 by %c240_i32 dim 1 : vector<4x256xf32>, i32 -> vector<4x256xf32>
    %c7 = arith.constant 7 : index
    %c0_35 = arith.constant 0 : index
    %c0_36 = arith.constant 0 : index
    %69 = vector.load %arg4[%c7, %c0_35, %c0_36] : memref<9x1x256xf32, #tpu.memory_space<vmem>>, vector<1x1x256xf32>
    %70 = vector.shape_cast %69 : vector<1x1x256xf32> to vector<1x256xf32>
    %71 = vector.broadcast %70 : vector<1x256xf32> to vector<4x256xf32>
    %72 = arith.mulf %68, %71 : vector<4x256xf32>
    %c7_37 = arith.constant 7 : index
    %c0_38 = arith.constant 0 : index
    %c0_39 = arith.constant 0 : index
    %73 = vector.load %arg2[%c7_37, %c0_38, %c0_39] : memref<9x4x1xf32, #tpu.memory_space<vmem>>, vector<1x4x1xf32>
    %74 = vector.shape_cast %73 : vector<1x4x1xf32> to vector<4x1xf32>
    %75 = vector.broadcast %74 : vector<4x1xf32> to vector<4x256xf32>
    %76 = arith.mulf %72, %75 : vector<4x256xf32>
    %77 = arith.addf %67, %76 : vector<4x256xf32>
    %c239_i32 = arith.constant 239 : i32
    %78 = tpu.dynamic_rotate %1 by %c239_i32 dim 1 : vector<4x256xf32>, i32 -> vector<4x256xf32>
    %c8 = arith.constant 8 : index
    %c0_40 = arith.constant 0 : index
    %c0_41 = arith.constant 0 : index
    %79 = vector.load %arg4[%c8, %c0_40, %c0_41] : memref<9x1x256xf32, #tpu.memory_space<vmem>>, vector<1x1x256xf32>
    %80 = vector.shape_cast %79 : vector<1x1x256xf32> to vector<1x256xf32>
    %81 = vector.broadcast %80 : vector<1x256xf32> to vector<4x256xf32>
    %82 = arith.mulf %78, %81 : vector<4x256xf32>
    %c8_42 = arith.constant 8 : index
    %c0_43 = arith.constant 0 : index
    %c0_44 = arith.constant 0 : index
    %83 = vector.load %arg2[%c8_42, %c0_43, %c0_44] : memref<9x4x1xf32, #tpu.memory_space<vmem>>, vector<1x4x1xf32>
    %84 = vector.shape_cast %83 : vector<1x4x1xf32> to vector<4x1xf32>
    %85 = vector.broadcast %84 : vector<4x1xf32> to vector<4x256xf32>
    %86 = arith.mulf %82, %85 : vector<4x256xf32>
    %87 = arith.addf %77, %86 : vector<4x256xf32>
    %c0_45 = arith.constant 0 : index
    %c0_46 = arith.constant 0 : index
    %88 = vector.load %arg3[%c0_45, %c0_46] : memref<8x4xf32, #tpu.memory_space<vmem>>, vector<8x4xf32>
    %cst_47 = arith.constant dense<0.000000e+00> : vector<8x256xf32>
    %89 = tpu.matmul %88, %87, %cst_47 {dimension_numbers = #tpu.dot_dimension_numbers<[1], [0], [0], [1], [0, 0, 1, 1], [], []>} : vector<8x4xf32>, vector<4x256xf32>, vector<8x256xf32> -> vector<8x256xf32>
    %c0_48 = arith.constant 0 : index
    %c0_49 = arith.constant 0 : index
    %c0_50 = arith.constant 0 : index
    %90 = vector.load %arg5[%c0_48, %c0_49, %c0_50] : memref<1x8x256xf32, #tpu.memory_space<vmem>>, vector<1x8x256xf32>
    %91 = vector.shape_cast %90 : vector<1x8x256xf32> to vector<8x256xf32>
    %92 = vector.shape_cast %89 : vector<8x256xf32> to vector<1x8x256xf32>
    tpu.vector_store %arg5[%c0_48, %c0_49, %c0_50], %92 {strides = array<i32>} : memref<1x8x256xf32, #tpu.memory_space<vmem>>, vector<1x8x256xf32>,
    return
  }
  func.func @transform_0(%arg0: i32) -> (i32, i32, i32) {
    %c0_i32 = arith.constant 0 : i32
    %c0_i32_0 = arith.constant 0 : i32
    %c0_i32_1 = arith.constant 0 : i32
    return %arg0, %c0_i32, %c0_i32_0 : i32, i32, i32
  }
  func.func @transform_1(%arg0: i32) -> (i32, i32, i32) {
    %c0_i32 = arith.constant 0 : i32
    %c0_i32_0 = arith.constant 0 : i32
    %c0_i32_1 = arith.constant 0 : i32
    %c0_i32_2 = arith.constant 0 : i32
    return %c0_i32, %c0_i32_0, %c0_i32_1 : i32, i32, i32
  }
  func.func @transform_2(%arg0: i32) -> (i32, i32) {
    %c0_i32 = arith.constant 0 : i32
    %c0_i32_0 = arith.constant 0 : i32
    %c0_i32_1 = arith.constant 0 : i32
    return %c0_i32, %c0_i32_0 : i32, i32
  }
  func.func @transform_3(%arg0: i32) -> (i32, i32, i32) {
    %c0_i32 = arith.constant 0 : i32
    %c0_i32_0 = arith.constant 0 : i32
    %c0_i32_1 = arith.constant 0 : i32
    %c0_i32_2 = arith.constant 0 : i32
    return %c0_i32, %c0_i32_0, %c0_i32_1 : i32, i32, i32
  }
  func.func @transform_4(%arg0: i32) -> (i32, i32, i32) {
    %c0_i32 = arith.constant 0 : i32
    %c0_i32_0 = arith.constant 0 : i32
    %c0_i32_1 = arith.constant 0 : i32
    return %arg0, %c0_i32, %c0_i32_0 : i32, i32, i32
  }
}

</mosaic_0001>

<bundles_post_ra>
// kernel: separable_conv2d.1
= control target key start
LH: loop header
LB: loop body
LE: loop exit
PB: predicated region body
PF: predicated region fallthrough
CT: control target
= control target key end

     0   :  { %s681_s15 = smov 0   ;;  %s784_s0 = inlined_call_operand.vmem [shape: f32[2,4,256], index: 0, kind: input, shape index: {}]   ;;  %s785_s1 = inlined_call_operand.vmem [shape: f32[9,4,1], index: 1, kind: input, shape index: {}]   ;;  %s786_s2 = inlined_call_operand.vmem [shape: f32[8,4], index: 2, kind: input, shape index: {}]   ;;  %s787_s3 = inlined_call_operand.vmem [shape: f32[9,1,256], index: 3, kind: input, shape index: {}]   ;;  %s788_s4 = inlined_call_operand.vmem [shape: f32[2,8,256], index: 4, kind: output, shape index: {}]  }
   0x1 LB: > { %s585_s16 = sadd.s32 4294967295, %s644_s15   ;;  %p589_p0 = scmp.ge.s32.totalorder %s644_s15, 1  ;;  %s644_s15 = sphi %s681_s15, %s14_s15  }
   0x2   : > { %p162_p1 = scmp.lt.s32.totalorder %s644_s15, 3 }
   0x4   : > { %p163_p2 = pnand %p589_p0, %p162_p1 }
   0x5   : > { %p188_p3 = scmp.lt.s32.totalorder (!%p163_p2), %s585_s16, 1  ;;  %s647_s29 = smov (!%p163_p2), 17  }
   0x6   : > { %166 = sbr.rel (%p163_p2) target bundleno = 429 (0x1ad), region = 36  ;;  %s648_s6 = smov (!%p163_p2), 16  }
   0x7   : > { %s649_s7 = smov (!%p163_p2), 15   ;;  %s650_s8 = smov (!%p163_p2), 1  }
   0x8   : > { %s652_s13 = smov (!%p163_p2), 127   ;;  %s653_s18 = smov (!%p163_p2), 113  }
   0x9   : > { %s654_s19 = smov (!%p163_p2), 112   ;;  %s655_s20 = smov (!%p163_p2), 111  }
   0xb   : > { %v600_v0 = vld [vmem:[%s785_s1 + $0x10] sm:$0xf]  ;;  %v222_v1 = vld [vmem:[%s785_s1] sm:$0xf]  ;;  %v646_v2 = vmov 0   ;;  %s790_s16 = smov (!%p188_p3, %s585_s16), 1  ;;  %v209_v44 = vlaneseq }
   0xc   : > { %635 = vset.pattern.permute.xlu0 %v646_v2  ;;  %636 = vset.pattern.permute.xlu1 %v646_v2  ;;  %v595_v3 = vld [vmem:[%s785_s1 + $0x4] sm:$0xf]  ;;  %s615_s23 = sshll.u32 %s790_s16, 3  ;;  %v597_v5 = vld [vmem:[%s785_s1 + $0x8] sm:$0xf]  ;;  %vm481_vm8 = vcmask 1043456  }
   0xd   : > { %332 = vperm.xlu0 %635, %v600_v0   ;;  %225 = vperm.xlu1 %636, %v222_v1   ;;  %s192_s26 = scalar_lea.vmem %s784_s0, %s615_s23  ;;  %v599_v8 = vld [vmem:[%s785_s1 + $0xc] sm:$0xf]  ;;  %v602_v15 = vld [vmem:[%s785_s1 + $0x14] sm:$0xf]  ;;  %v604_v16 = vld [vmem:[%s785_s1 + $0x18] sm:$0xf] }
   0xe   : > { %637 = vset.pattern.permute.xlu2 %v646_v2  ;;  %v198_v4 = vld [vmem:[%s192_s26] sm:$0xff]  ;;  %v651_v17 = vmov 839922192   ;;  %v606_v27 = vld [vmem:[%s785_s1 + $0x1c] sm:$0xf]  ;;  %v728_v47 = vand.u32 127, %v209_v44 }
   0xf   : > { %257 = vperm.xlu2 %637, %v595_v3   ;;  %200 = vst [vmem:[#allocation1] ss:$2 sm:$0xff] %v198_v4  ;;  %v335_v18 = vunpack.c.l.s4 %v651_v17  ;;  %v608_v34 = vld [vmem:[%s785_s1 + $0x20] sm:$0xf]  ;;  %v596_v59 = vld [vmem:[%s787_s3 + $0x4] sm:$0x3] }
  0x10   : > { %v214_v48 = vld [vmem:[%s787_s3] sm:$0x3]  ;;  %v594_v49 = vld [vmem:[%s787_s3 + $0x2] sm:$0x3]  ;;  %vm211_vm0 = vcmp.lt.s32.totalorder %v728_v47, 17  ;;  %vm241_vm1 = vcmp.lt.s32.totalorder %v728_v47, 16 }
  0x11   : > { %v336_v19 = vunpack.c.0.s8 %v335_v18  ;;  %v216_v52 = vperm.slane %v214_v48, 0  ;;  %v247_v53 = vperm.slane %v594_v49, 0  ;;  %v217_v55 = vperm.slane %v214_v48, 1  ;;  %s616_s17 = sshll.u32 %s790_s16, 4 }
  0x12   : > { %v248_v57 = vperm.slane %v594_v49, 1  ;;  %vm273_vm2 = vcmp.lt.s32.totalorder %v728_v47, 15  ;;  %v279_v0 = vperm.slane %v596_v59, 0  ;;  %v280_v3 = vperm.slane %v596_v59, 1  ;;  %v607_v59 = vld [vmem:[%s787_s3 + $0x10] sm:$0x3] }
  0x13   : > { %vm305_vm3 = vcmp.lt.s32.totalorder %v728_v47, 1  ;;  %vm357_vm4 = vcmp.lt.s32.totalorder %v728_v47, 127  ;;  %vm389_vm5 = vcmp.lt.s32.totalorder %v728_v47, 113  ;;  %vm421_vm6 = vcmp.lt.s32.totalorder %v728_v47, 112 }
  0x14   : > { %vm453_vm7 = vcmp.lt.s32.totalorder %v728_v47, 111  ;;  %v476_v47 = vld [vmem:[%s786_s2] sm:$0xff]  ;;  %vm477_vm9 = vcmask 31744  }
  0x16   : > { %v201_v6 = vld.sshfl [vmem:[#allocation1] sm:$0xff pattern:$0x75316420]  ;;  %v202_v7 = vld.sshfl [vmem:[#allocation1 + $0x8] sm:$0xff pattern:$0x75316420] }
  0x17   : > { %289 = vperm.xlu2 %637, %v597_v5   ;;  %205 = vrot.lane.b32.xlu0 %v201_v6, %s647_s29  ;;  %232 = vst [vmem:[#allocation1] ss:$2 sm:$0xff] %v198_v4  ;;  %v598_v6 = vld [vmem:[%s787_s3 + $0x6] sm:$0x3] }
  0x18   : > { %207 = vrot.lane.b32.xlu1 %v202_v7, %s647_s29  ;;  %v312_v17 = vperm.slane %v598_v6, 1 }
  0x1e   : > { %v233_v9 = vld.sshfl [vmem:[#allocation1] sm:$0xff pattern:$0x75316420]  ;;  %v234_v10 = vld.sshfl [vmem:[#allocation1 + $0x8] sm:$0xff pattern:$0x75316420] }
  0x1f   : > { %321 = vperm.xlu0 %635, %v599_v8   ;;  %264 = vst [vmem:[#allocation1] ss:$2 sm:$0xff] %v198_v4  ;;  %239 = vrot.lane.b32.xlu2 %v234_v10, %s648_s6 }
  0x20   : > { %237 = vrot.lane.b32.xlu1 %v233_v9, %s648_s6 }
  0x26   : > { %v266_v11 = vld.sshfl [vmem:[#allocation1 + $0x8] sm:$0xff pattern:$0x75316420]  ;;  %v265_v12 = vld.sshfl [vmem:[#allocation1] sm:$0xff pattern:$0x75316420] }
  0x27   : > { %271 = vrot.lane.b32.xlu0 %v266_v11, %s649_s7  ;;  %296 = vst [vmem:[#allocation1] ss:$2 sm:$0xff] %v198_v4  ;;  %269 = vrot.lane.b32.xlu2 %v265_v12, %s649_s7 }
  0x2e   : > { %v298_v13 = vld.sshfl [vmem:[#allocation1 + $0x8] sm:$0xff pattern:$0x75316420]  ;;  %v297_v14 = vld.sshfl [vmem:[#allocation1] sm:$0xff pattern:$0x75316420] }
  0x2f   : > { %303 = vrot.lane.b32.xlu1 %v298_v13, %s650_s8  ;;  %301 = vrot.lane.b32.xlu0 %v297_v14, %s650_s8 }
  0x30   : > { %373 = vperm.xlu2 %637, %v602_v15  }
  0x38   : > { %405 = vperm.xlu2 %637, %v604_v16   ;;  %v311_v16 = vperm.slane %v598_v6, 0  ;;  %v460_v6 = vperm.slane %v607_v59, 1 }
  0x69   : > { %v258_v35 = vpop.permute.xlu2 %257 }
  0x71   : > { %v290_v37 = vpop.permute.xlu2 %289 }
  0x79   : > { %v240_v40 = vpop.permute.xlu2 %239 }
  0x7f   : > { %v333_v20 = vpop.permute.xlu0 %332  ;;  %v226_v36 = vpop.permute.xlu1 %225 }
  0x80   : > { %v337_v21 = vperm.slane %v333_v20, %v336_v19 }
  0x81   : > { %v270_v43 = vpop.permute.xlu2 %269 }
  0x82   : > { %v339_v22 = vmul.f32 %v337_v21, %v198_v4 }
  0x84   : > { %341 = vst [vmem:[#allocation1] ss:$2 sm:$0xff] %v339_v22 }
  0x89   : > { %v206_v38 = vpop.permute.xlu0 %205 }
  0x8a   : > { %v208_v39 = vpop.permute.xlu1 %207  ;;  %v736_v50 = vpop.permute.xlu2 %373 }
  0x8b   : > { %v716_v23 = vld.sshfl [vmem:[#allocation1] sm:$0xff pattern:$0x75316420]  ;;  %v718_v24 = vld.sshfl [vmem:[#allocation1 + $0x8] sm:$0xff pattern:$0x75316420]  ;;  %v213_v56 = vsel %vm211_vm0, %v208_v39, %v206_v38  ;;  %v212_v60 = vsel %vm211_vm0, %v206_v38, %v208_v39 }
  0x8c   : > { %348 = vst [vmem:[#allocation1] ss:$2 sm:$0xff] %v198_v4  ;;  %v220_v62 = vmul.f32 %v216_v52, %v213_v56  ;;  %v221_v1 = vmul.f32 %v217_v55, %v212_v60 }
  0x8e   : > { %v228_v9 = vmul.f32 %v226_v36, %v220_v62  ;;  %v229_v13 = vmul.f32 %v226_v36, %v221_v1 }
  0x91   : > { %v726_v41 = vpop.permute.xlu0 %321 }
  0x92   : > { %v238_v42 = vpop.permute.xlu1 %237  ;;  %v406_v7 = vpop.permute.xlu2 %405 }
  0x93   : > { %v350_v25 = vld.sshfl [vmem:[#allocation1 + $0x8] sm:$0xff pattern:$0x75316420]  ;;  %v349_v26 = vld.sshfl [vmem:[#allocation1] sm:$0xff pattern:$0x75316420]  ;;  %v243_v58 = vsel %vm241_vm1, %v240_v40, %v238_v42  ;;  %v242_v61 = vsel %vm241_vm1, %v238_v42, %v240_v40 }
  0x94   : > { %355 = vrot.lane.b32.xlu2 %v350_v25, %s652_s13  ;;  %353 = vrot.lane.b32.xlu1 %v349_v26, %s652_s13  ;;  %380 = vst [vmem:[#allocation1] ss:$2 sm:$0xff] %v198_v4  ;;  %v251_v63 = vmul.f32 %v247_v53, %v243_v58  ;;  %v252_v2 = vmul.f32 %v248_v57, %v242_v61  ;;  %v605_v42 = vld [vmem:[%s787_s3 + $0xe] sm:$0x3] }
  0x95   : > { %v427_v52 = vperm.slane %v605_v42, 0  ;;  %v428_v53 = vperm.slane %v605_v42, 1 }
  0x96   : > { %v260_v10 = vmul.f32 %v258_v35, %v251_v63  ;;  %v261_v14 = vmul.f32 %v258_v35, %v252_v2 }
  0x98   : > { %v262_v20 = vadd.f32 %v260_v10, %v228_v9  ;;  %v263_v22 = vadd.f32 %v261_v14, %v229_v13 }
  0x99   : > { %v272_v45 = vpop.permute.xlu0 %271 }
  0x9a   : > { %v274_v5 = vsel %vm273_vm2, %v270_v43, %v272_v45 }
  0x9b   : > { %v382_v28 = vld.sshfl [vmem:[#allocation1 + $0x8] sm:$0xff pattern:$0x75316420]  ;;  %v381_v29 = vld.sshfl [vmem:[#allocation1] sm:$0xff pattern:$0x75316420]  ;;  %v284_v15 = vmul.f32 %v280_v3, %v274_v5 }
  0x9c   : > { %437 = vperm.xlu2 %637, %v606_v27   ;;  %387 = vrot.lane.b32.xlu1 %v382_v28, %s653_s18  ;;  %412 = vst [vmem:[#allocation1] ss:$2 sm:$0xff] %v198_v4  ;;  %v601_v28 = vld [vmem:[%s787_s3 + $0xa] sm:$0x3]  ;;  %v459_v5 = vperm.slane %v607_v59, 0 }
  0x9d   : > { %385 = vrot.lane.b32.xlu0 %v381_v29, %s653_s18  ;;  %v293_v25 = vmul.f32 %v290_v37, %v284_v15  ;;  %v363_v35 = vperm.slane %v601_v28, 0  ;;  %v364_v36 = vperm.slane %v601_v28, 1 }
  0xa1   : > { %v304_v46 = vpop.permute.xlu1 %303  ;;  %v302_v54 = vpop.permute.xlu0 %301 }
  0xa2   : > { %v306_v18 = vsel %vm305_vm3, %v302_v54, %v304_v46  ;;  %v307_v19 = vsel %vm305_vm3, %v304_v46, %v302_v54 }
  0xa3   : > { %v414_v30 = vld.sshfl [vmem:[#allocation1 + $0x8] sm:$0xff pattern:$0x75316420]  ;;  %v413_v31 = vld.sshfl [vmem:[#allocation1] sm:$0xff pattern:$0x75316420]  ;;  %v315_v26 = vmul.f32 %v311_v16, %v307_v19  ;;  %v316_v27 = vmul.f32 %v312_v17, %v306_v18 }
  0xa4   : > { %419 = vrot.lane.b32.xlu1 %v414_v30, %s654_s19  ;;  %444 = vst [vmem:[#allocation1] ss:$2 sm:$0xff] %v198_v4  ;;  %v275_v4 = vsel %vm273_vm2, %v272_v45, %v270_v43 }
  0xa5   : > { %417 = vrot.lane.b32.xlu0 %v413_v31, %s654_s19  ;;  %v283_v11 = vmul.f32 %v279_v0, %v275_v4  ;;  %v603_v31 = vld [vmem:[%s787_s3 + $0xc] sm:$0x3]  ;;  %v325_v38 = vmul.f32 %v726_v41, %v316_v27 }
  0xa6   : > { %v395_v43 = vperm.slane %v603_v31, 0  ;;  %v396_v44 = vperm.slane %v603_v31, 1 }
  0xa7   : > { %v292_v21 = vmul.f32 %v290_v37, %v283_v11  ;;  %v324_v37 = vmul.f32 %v726_v41, %v315_v26 }
  0xa9   : > { %v294_v30 = vadd.f32 %v292_v21, %v262_v20 }
  0xab   : > { %v446_v32 = vld.sshfl [vmem:[#allocation1 + $0x8] sm:$0xff pattern:$0x75316420]  ;;  %v445_v33 = vld.sshfl [vmem:[#allocation1] sm:$0xff pattern:$0x75316420]  ;;  %v326_v54 = vadd.f32 %v324_v37, %v294_v30 }
  0xac   : > { %451 = vrot.lane.b32.xlu1 %v446_v32, %s655_s20 }
  0xad   : > { %449 = vrot.lane.b32.xlu0 %v445_v33, %s655_s20  ;;  %v295_v33 = vadd.f32 %v293_v25, %v263_v22  ;;  %v346_v2 = vadd.f32 %v716_v23, %v326_v54  ;;  %s197_s20 = scalar_lea.vmem %s788_s4, %s616_s17 }
  0xaf   : > { %v327_v55 = vadd.f32 %v325_v38, %v295_v33 }
  0xb1   : > { %v347_v1 = vadd.f32 %v718_v24, %v327_v55 }
  0xb5   : > { %469 = vperm.xlu0 %635, %v608_v34  }
  0xee   : > { %v356_v34 = vpop.permute.xlu2 %355 }
 0x106   : > { %v354_v51 = vpop.permute.xlu1 %353 }
 0x107   : > { %v358_v39 = vsel %vm357_vm4, %v354_v51, %v356_v34  ;;  %v359_v40 = vsel %vm357_vm4, %v356_v34, %v354_v51 }
 0x108   : > { %v367_v48 = vmul.f32 %v363_v35, %v358_v39  ;;  %v368_v49 = vmul.f32 %v364_v36, %v359_v40 }
 0x10a   : > { %v376_v60 = vmul.f32 %v736_v50, %v367_v48  ;;  %v377_v61 = vmul.f32 %v736_v50, %v368_v49 }
 0x10c   : > { %v378_v11 = vadd.f32 %v376_v60, %v346_v2  ;;  %v379_v50 = vadd.f32 %v377_v61, %v347_v1 }
 0x10e   : > { %v388_v8 = vpop.permute.xlu1 %387 }
 0x10f   : > { %v386_v12 = vpop.permute.xlu0 %385 }
 0x110   : > { %v390_v45 = vsel %vm389_vm5, %v386_v12, %v388_v8  ;;  %v391_v46 = vsel %vm389_vm5, %v388_v8, %v386_v12  ;;  %v438_v8 = vpop.permute.xlu2 %437 }
 0x111   : > { %v399_v57 = vmul.f32 %v395_v43, %v390_v45  ;;  %v400_v51 = vmul.f32 %v396_v44, %v391_v46 }
 0x113   : > { %v408_v3 = vmul.f32 %v406_v7, %v399_v57  ;;  %v409_v4 = vmul.f32 %v406_v7, %v400_v51 }
 0x115   : > { %v410_v24 = vadd.f32 %v408_v3, %v378_v11  ;;  %v411_v23 = vadd.f32 %v409_v4, %v379_v50 }
 0x116   : > { %v420_v29 = vpop.permute.xlu1 %419 }
 0x117   : > { %v418_v32 = vpop.permute.xlu0 %417 }
 0x118   : > { %v422_v56 = vsel %vm421_vm6, %v418_v32, %v420_v29  ;;  %v423_v41 = vsel %vm421_vm6, %v420_v29, %v418_v32 }
 0x119   : > { %v431_v62 = vmul.f32 %v427_v52, %v422_v56  ;;  %v432_v63 = vmul.f32 %v428_v53, %v423_v41 }
 0x11b   : > { %v440_v12 = vmul.f32 %v438_v8, %v431_v62  ;;  %v441_v13 = vmul.f32 %v438_v8, %v432_v63 }
 0x11d   : > { %v442_v18 = vadd.f32 %v440_v12, %v410_v24  ;;  %v443_v19 = vadd.f32 %v441_v13, %v411_v23 }
 0x11e   : > { %v452_v0 = vpop.permute.xlu1 %451 }
 0x11f   : > { %v450_v58 = vpop.permute.xlu0 %449 }
 0x120   : > { %v454_v9 = vsel %vm453_vm7, %v450_v58, %v452_v0  ;;  %v455_v10 = vsel %vm453_vm7, %v452_v0, %v450_v58 }
 0x121   : > { %v463_v14 = vmul.f32 %v459_v5, %v454_v9  ;;  %v464_v15 = vmul.f32 %v460_v6, %v455_v10 }
 0x127   : > { %v470_v16 = vpop.permute.xlu0 %469 }
 0x128   : > { %v472_v7 = vmul.f32 %v470_v16, %v463_v14  ;;  %v473_v17 = vmul.f32 %v470_v16, %v464_v15 }
 0x12a   : > { %v474_v20 = vadd.f32 %v472_v7, %v442_v18  ;;  %v475_v21 = vadd.f32 %v473_v17, %v443_v19 }
 0x12c   : > { %609 = vmatpush.msk.msra.mxu0 %vm481_vm8, %v474_v20  ;;  %611 = vmatpush.msk.msra.mxu1 %vm481_vm8, %v475_v21 }
 0x12d   : > { %610 = vmatmul.msk.f32.vlgmr.msra.gmra.mxu0 %vm477_vm9, %v476_v47  ;;  %612 = vmatmul.msk.f32.vlgmr.msra.gmra.mxu1 %vm477_vm9, %v476_v47 }
 0x1aa   : > { %v505_v22 = vpop.f32.mrf.mxu0  ;;  %v525_v25 = vpop.f32.mrf.mxu1 }
 0x1ab   : > { %528 = vst [vmem:[%s197_s20] sm:$0xff] %v505_v22 }
 0x1ac   : > { %529 = vst [vmem:[%s197_s20 + $0x8] sm:$0xff] %v525_v25 }
 0x1ad PF: > { %s14_s15 = sadd.s32 1, %s644_s15  }
 0x1ae   : > { %p11_p4 = scmp.ge.s32.totalorder %s14_s15, 4  }
 0x1b0   :  { %13 = sbr.rel (!%p11_p4) target bundleno = 1 (0x1), region = 81 }

</bundles_post_ra>
